<compile_context>
chip_gen: v5e
topology: v5e:2x2
jax: 0.10.0
libtpu: 0.0.40
codegen_flags: <defaults>
</compile_context>

<pallas_src>
import jax
import jax.numpy as jnp
from jax.experimental import pallas as pl
from jax.experimental.pallas import tpu as pltpu

_LANE = 128
_TARGET_BLOCK_BYTES = 1 << 20   # 1 MiB per block buffer (safe on all TPU gens)


def _h_swish_kernel(x_ref, o_ref):
    # y = x * relu6(x + 3) / 6   (lane-dense tile, pure VPU)
    x = x_ref[...]
    o_ref[...] = x * (jnp.clip(x + 3.0, 0.0, 6.0) * (1.0 / 6.0))


def h_swish(x):
    """h_swish applied elementwise to an arbitrary-shaped float tensor."""
    orig_shape = x.shape
    total = x.size
    dtype = x.dtype
    itemsize = jnp.dtype(dtype).itemsize

    # Pick the widest lane dim (multiple of 128) that divides the element
    # count: reshape is then a free bitcast (no pad copy) and stores are wide.
    cols = None
    for c in (8192, 4096, 2048, 1024, 512, 256, 128):
        if total % c == 0:
            cols = c
            break

    if cols is None:
        # Rare fallback: pad the flat tensor up to a multiple of 128 lanes.
        cols = _LANE
        rows = -(-total // cols)                       # ceil
        pad = rows * cols - total
        xf = jnp.pad(x.reshape(-1), (0, pad)).reshape(rows, cols)
    else:
        pad = 0
        rows = total // cols
        xf = x.reshape(rows, cols)

    # Block rows: as many as fit the VMEM budget. Either the full row extent
    # (always a legal block dim) or a multiple of 8 (sublane-aligned); partial
    # trailing blocks are handled by Pallas (elementwise => safe).
    tm_budget = max(1, _TARGET_BLOCK_BYTES // (cols * itemsize))
    if rows <= tm_budget:
        tm = rows
    else:
        tm = max(8, (tm_budget // 8) * 8)

    grid = (pl.cdiv(rows, tm),)
    cost = pl.CostEstimate(
        flops=5 * total,                       # add, 2x clamp, 2x mul (approx.)
        transcendentals=0,
        bytes_accessed=2 * rows * cols * itemsize,
    )

    out = pl.pallas_call(
        _h_swish_kernel,
        out_shape=jax.ShapeDtypeStruct((rows, cols), dtype),
        grid=grid,
        in_specs=[pl.BlockSpec((tm, cols), lambda i: (i, 0))],
        out_specs=pl.BlockSpec((tm, cols), lambda i: (i, 0)),
        compiler_params=pltpu.CompilerParams(
            dimension_semantics=("parallel",)),        # megacore split on v7x
        cost_estimate=cost,
    )(xf)

    if pad:
        return out.reshape(-1)[:total].reshape(orig_shape)
    return out.reshape(orig_shape)


if __name__ == "__main__":
    key = jax.random.PRNGKey(0)

    # NCHW input, same layout/dtype the PyTorch module would see.
    x = 4.0 * jax.random.normal(key, (2, 4, 16, 16), jnp.float32)
    out = h_swish(x)
    jax.block_until_ready(out)
    ref = x * (jnp.clip(x + 3.0, 0.0, 6.0) / 6.0)
    assert out.shape == x.shape and out.dtype == x.dtype
    assert jnp.allclose(out, ref, atol=1e-6, rtol=1e-6), "mismatch vs reference"

    # Exercise the non-128-divisible fallback path too (105 elements).
    x2 = 4.0 * jax.random.normal(jax.random.PRNGKey(1), (3, 5, 7), jnp.float32)
    out2 = h_swish(x2)
    jax.block_until_ready(out2)
    ref2 = x2 * (jnp.clip(x2 + 3.0, 0.0, 6.0) / 6.0)
    assert out2.shape == x2.shape
    assert jnp.allclose(out2, ref2, atol=1e-6, rtol=1e-6), "mismatch (pad path)"

    print("KERNEL_OK")
</pallas_src>

<mosaic_0001>
module attributes {stable_mosaic.version = 11 : i64} {
  func.func @_h_swish_kernel(%arg0: i32, %arg1: memref<1x2048xf32, #tpu.memory_space<vmem>>, %arg2: memref<1x2048xf32, #tpu.memory_space<vmem>>) attributes {dimension_semantics = [#tpu.dimension_semantics<parallel>], iteration_bounds = array<i64: 1>, scalar_prefetch = 0 : i64, scratch_operands = 0 : i64, tpu.core_type = #tpu.core_type<tc>, window_params = [{transform_indices = @transform_0, window_bounds = array<i64: 1, 2048>}, {transform_indices = @transform_1, window_bounds = array<i64: 1, 2048>}]} {
    %c0 = arith.constant 0 : index
    %c0_0 = arith.constant 0 : index
    %0 = vector.load %arg1[%c0, %c0_0] : memref<1x2048xf32, #tpu.memory_space<vmem>>, vector<1x2048xf32>
    %cst = arith.constant 3.000000e+00 : f32
    %1 = vector.broadcast %cst : f32 to vector<1x2048xf32>
    %2 = arith.addf %0, %1 : vector<1x2048xf32>
    %cst_1 = arith.constant 0.000000e+00 : f32
    %cst_2 = arith.constant 6.000000e+00 : f32
    %3 = vector.broadcast %cst_1 : f32 to vector<1x2048xf32>
    %4 = arith.maximumf %3, %2 : vector<1x2048xf32>
    %5 = vector.broadcast %cst_2 : f32 to vector<1x2048xf32>
    %6 = arith.minimumf %5, %4 : vector<1x2048xf32>
    %cst_3 = arith.constant 0.166666672 : f32
    %7 = vector.broadcast %cst_3 : f32 to vector<1x2048xf32>
    %8 = arith.mulf %6, %7 : vector<1x2048xf32>
    %9 = arith.mulf %0, %8 : vector<1x2048xf32>
    %c0_4 = arith.constant 0 : index
    %c0_5 = arith.constant 0 : index
    %10 = vector.load %arg2[%c0_4, %c0_5] : memref<1x2048xf32, #tpu.memory_space<vmem>>, vector<1x2048xf32>
    tpu.vector_store %arg2[%c0_4, %c0_5], %9 {strides = array<i32>} : memref<1x2048xf32, #tpu.memory_space<vmem>>, vector<1x2048xf32>,
    return
  }
  func.func @transform_0(%arg0: i32) -> (i32, i32) {
    %c0_i32 = arith.constant 0 : i32
    %c0_i32_0 = arith.constant 0 : i32
    return %arg0, %c0_i32 : i32, i32
  }
  func.func @transform_1(%arg0: i32) -> (i32, i32) {
    %c0_i32 = arith.constant 0 : i32
    %c0_i32_0 = arith.constant 0 : i32
    return %arg0, %c0_i32 : i32, i32
  }
}

</mosaic_0001>

<bundles_post_ra>
// kernel: tpu_custom_call.1
= control target key start
LH: loop header
LB: loop body
LE: loop exit
PB: predicated region body
PF: predicated region fallthrough
CT: control target
= control target key end

     0   :  { %6 = vsyncpa [#allocation3], 0  ;;  %s126_s0 = inlined_call_operand.hbm [shape: f32[1,2048], index: 0, kind: input, shape index: {}]   ;;  %s127_s1 = inlined_call_operand.hbm [shape: f32[1,2048], index: 1, kind: output, shape index: {}]  }
   0x1   :  { %7 = vsyncpa [#allocation4], 0  ;;  %s13_s8 = sshll.u32 %s126_s0, 4  ;;  %s108_s9 = smov [#allocation2]   ;;  %s14_s8 = int_to_ptr.hbm [resolvable:$true] %s13_s8 }
   0x2   :  { %s15_s10 = sshll.u32 %s108_s9, 4  ;;  %s16_s10 = int_to_ptr.vmem [resolvable:$true] %s15_s10 }
   0x3   :  { %18 = dma.hbm_to_vmem [thread:$0]  %s14_s8, 256, %s16_s10, [#allocation3]  }
   0x4   :  { %104 = dma.done.wait [#allocation3], 256  }
   0x5   :  { %105 = vsyncadd [#allocation3], 4294967040  ;;  %v23_v0 = vld [vmem:[#allocation2] sm:$0xff]  ;;  %v24_v1 = vld [vmem:[#allocation2 + $0x8] sm:$0xff]  ;;  %s109_s11 = smov [#allocation5]   ;;  %s44_s14 = sshll.u32 %s127_s1, 4  ;;  %s45_s14 = int_to_ptr.hbm [resolvable:$true] %s44_s14 }
   0x6   :  { %v25_v2 = vadd.f32 3.0, %v23_v0  ;;  %v26_v3 = vadd.f32 3.0, %v24_v1  ;;  %s42_s12 = sshll.u32 %s109_s11, 4  ;;  %s43_s12 = int_to_ptr.vmem [resolvable:$true] %s42_s12 }
   0x8   :  { %v27_v4 = vmax.f32 %v25_v2, 0.0  ;;  %v28_v5 = vmax.f32 %v26_v3, 0.0 }
   0xa   :  { %v29_v6 = vmin.f32 %v27_v4, 6.0  ;;  %v30_v7 = vmin.f32 %v28_v5, 6.0 }
   0xc   :  { %v31_v8 = vmul.f32 0.16666667, %v29_v6  ;;  %v32_v9 = vmul.f32 0.16666667, %v30_v7 }
   0xe   :  { %v33_v10 = vmul.f32 %v31_v8, %v23_v0  ;;  %v34_v11 = vmul.f32 %v32_v9, %v24_v1 }
  0x10   :  { %35 = vst [vmem:[#allocation5] sm:$0xff] %v33_v10 }
  0x11   :  { %36 = vst [vmem:[#allocation5 + $0x8] sm:$0xff] %v34_v11 }
  0x12   :  { %47 = dma.vmem_to_hbm [thread:$0]  %s43_s12, 256, %s45_s14, [#allocation4]  }
  0x13   :  { %106 = dma.done.wait [#allocation4], 256  }
  0x14   :  { %107 = vsyncadd [#allocation4], 4294967040 }
  0x15   :  { %52 = vsyncpa [#allocation3], 1 }
  0x16   :  { %53 = vsyncpa [#allocation4], 1 }

</bundles_post_ra>
